<compile_context>
chip_gen: v5e
topology: v5e:2x2
jax: 0.10.0
libtpu: 0.0.40
codegen_flags: <defaults>
</compile_context>

<pallas_src>
import jax
import jax.numpy as jnp
from jax.experimental import pallas as pl
from jax.experimental.pallas import tpu as pltpu


def _round_up(n, m):
    return (n + m - 1) // m * m


def _cdiv(a, b):
    return (a + b - 1) // b


def linear_vae_forward(x, eps, params, *, batch_tile=1024,
                       act_dtype=jnp.float32, out_dtype=jnp.float32):
    """x: (B, C) float32, eps: (B, Z) float32 -> (B, C) reconstruction."""
    B, C = x.shape
    Z = eps.shape[1]
    H = params["enc_w1"].shape[1]

    LANE, SUB = 128, 16
    Hp, Zp, Cp = _round_up(H, LANE), _round_up(Z, LANE), _round_up(C, LANE)

    # --- Batch tiling: minimal padding, >= 2 grid steps when the batch allows
    # it (v7x megacore), tile near B / num_tiles rounded to the sublane pack.
    B16 = _round_up(B, SUB)
    tb_cap = max(SUB, _round_up(min(batch_tile, B16), SUB))
    nt = _cdiv(B16, tb_cap)
    if nt == 1 and B16 >= 2 * SUB:
        nt = 2
    TB = _round_up(_cdiv(B, nt), SUB)
    Bp = TB * nt

    bf16, f32 = jnp.bfloat16, jnp.float32

    # Streamed operands. If no batch padding is needed the caller's arrays are
    # handed straight to the kernel (zero extra HBM passes, cast in-kernel);
    # otherwise the single unavoidable pad copy is written in bf16.
    def prep_stream(a):
        if a.shape[0] == Bp:
            return a
        return jnp.pad(a.astype(bf16), ((0, Bp - a.shape[0]), (0, 0)))

    x_s = prep_stream(x)
    eps_s = prep_stream(eps)

    # Resident weights: bf16, output feature dims padded to lane multiples so
    # every matmul output (and the final store) is lane-dense; contraction dims
    # stay at their true sizes.  mu/sigma heads fused into one matrix.
    def pad2(a, rows, cols, dtype):
        out = jnp.zeros((rows, cols), dtype)
        return out.at[:a.shape[0], :a.shape[1]].set(a.astype(dtype))

    w1 = pad2(params["enc_w1"], C, Hp, bf16)            # (C, Hp)
    w_ms = jnp.concatenate(
        [pad2(params["mu_w"], Hp, Zp, bf16),
         pad2(params["sig_w"], Hp, Zp, bf16)], axis=1)  # (Hp, 2*Zp)
    dw1 = pad2(params["dec_w1"], Z, Hp, bf16)           # (Z, Hp)
    dw2 = pad2(params["dec_w2"], Hp, Cp, bf16)          # (Hp, Cp)

    # Single consolidated f32 bias vector with lane-aligned segment offsets.
    bias = jnp.concatenate(
        [pad2(params["enc_b1"], 1, Hp, f32),
         pad2(params["mu_b"], 1, Zp, f32),
         pad2(params["sig_b"], 1, Zp, f32),
         pad2(params["dec_b1"], 1, Hp, f32),
         pad2(params["dec_b2"], 1, Cp, f32)], axis=1)   # (1, 2*Hp + 2*Zp + Cp)
    n_bias = bias.shape[1]
    o_mu, o_sig, o_d1, o_d2 = Hp, Hp + Zp, Hp + 2 * Zp, 2 * Hp + 2 * Zp

    def kernel(x_ref, eps_ref, w1_ref, wms_ref, dw1_ref, dw2_ref, b_ref, out_ref):
        b_enc = b_ref[:, 0:Hp]
        b_mu = b_ref[:, o_mu:o_mu + Z]
        b_sig = b_ref[:, o_sig:o_sig + Z]
        b_d1 = b_ref[:, o_d1:o_d1 + Hp]
        b_d2 = b_ref[:, o_d2:o_d2 + Cp]

        # ---- Encoder: Linear -> ReLU (bf16 MXU, f32 accumulate) ----
        xb = x_ref[...].astype(bf16)
        h = jnp.dot(xb, w1_ref[...], preferred_element_type=f32) + b_enc
        h = jnp.maximum(h, 0.0)

        # ---- Fused mu / log_sigma heads: one MXU pass over (Hp, 2*Zp) ----
        ms = jnp.dot(h.astype(bf16), wms_ref[...], preferred_element_type=f32)
        mu = ms[:, 0:Z] + b_mu
        log_sigma = ms[:, Zp:Zp + Z] + b_sig

        # ---- Reparameterization at true latent width Z (f32 VPU/EUP) ----
        z = mu + jnp.exp(log_sigma * 0.5) * eps_ref[...].astype(f32)

        # ---- Decoder: Linear -> ReLU -> Linear -> Sigmoid ----
        hd = jnp.dot(z.astype(bf16), dw1_ref[...], preferred_element_type=f32) + b_d1
        hd = jnp.maximum(hd, 0.0)
        logits = jnp.dot(hd.astype(bf16), dw2_ref[...], preferred_element_type=f32) + b_d2
        # sigmoid(x) == 0.5*tanh(0.5*x) + 0.5 : one EUP push instead of exp+recip.
        lg = logits.astype(act_dtype)
        out_ref[...] = (0.5 * jnp.tanh(0.5 * lg) + 0.5).astype(out_ref.dtype)

    out_isz = jnp.dtype(out_dtype).itemsize
    x_isz = jnp.dtype(x_s.dtype).itemsize
    e_isz = jnp.dtype(eps_s.dtype).itemsize
    w_bytes = 2 * (C * Hp + Hp * 2 * Zp + Z * Hp + Hp * Cp) + 4 * n_bias

    # Advisory cost on true (unpadded) dims so XLA's scheduler isn't skewed.
    flops = 2 * Bp * (C * H + H * 2 * Z + Z * H + H * C)
    transcendentals = Bp * (Z + C)
    bytes_accessed = Bp * (C * x_isz + Z * e_isz + Cp * out_isz) + w_bytes

    # VMEM budget: double-buffered streams + double-buffered resident weights
    # + f32 intermediates, 1.5x headroom; never below the 32 MiB default and
    # never above v7x's 64 MiB per-core capacity.
    stream_bytes = 2 * TB * (C * x_isz + Z * e_isz + Cp * out_isz)
    interm_bytes = 4 * TB * (2 * Hp + 2 * Zp + 3 * Z + Cp)
    vmem_limit = int(min(max(1.5 * (stream_bytes + 2 * w_bytes + interm_bytes),
                             32 << 20), 64 << 20))

    out = pl.pallas_call(
        kernel,
        out_shape=jax.ShapeDtypeStruct((Bp, Cp), out_dtype),
        grid=(nt,),
        in_specs=[
            pl.BlockSpec((TB, C), lambda i: (i, 0)),        # x tile (streamed)
            pl.BlockSpec((TB, Z), lambda i: (i, 0)),        # eps tile (streamed)
            # TODO(synk): pipeline_mode=pl.Buffered(1) on the resident operands
            # below would free VMEM headroom for very large H / C configs.
            pl.BlockSpec((C, Hp), lambda i: (0, 0)),        # enc w1 (VMEM-resident)
            pl.BlockSpec((Hp, 2 * Zp), lambda i: (0, 0)),   # fused mu|sigma heads
            pl.BlockSpec((Z, Hp), lambda i: (0, 0)),        # dec w1
            pl.BlockSpec((Hp, Cp), lambda i: (0, 0)),       # dec w2
            pl.BlockSpec((1, n_bias), lambda i: (0, 0)),    # consolidated biases
        ],
        out_specs=pl.BlockSpec((TB, Cp), lambda i: (i, 0)),
        compiler_params=pltpu.CompilerParams(
            dimension_semantics=("parallel",),
            vmem_limit_bytes=vmem_limit),
        cost_estimate=pl.CostEstimate(
            flops=flops, transcendentals=transcendentals,
            bytes_accessed=bytes_accessed),
    )(x_s, eps_s, w1, w_ms, dw1, dw2, bias)

    # TODO(synk): fuse this de-padding slice into the downstream consumer.
    return out[:B, :C]


def init_params(key, z_dim, hidden, num_channels, dtype=jnp.float32):
    """Deterministic init (shapes match the PyTorch module; W stored (in, out))."""
    ks = jax.random.split(key, 10)

    def linear(kw, kb, fan_in, fan_out):
        bound = 1.0 / jnp.sqrt(jnp.asarray(fan_in, dtype))
        w = jax.random.uniform(kw, (fan_in, fan_out), dtype, -bound, bound)
        b = jax.random.uniform(kb, (1, fan_out), dtype, -bound, bound)
        return w, b

    enc_w1, enc_b1 = linear(ks[0], ks[1], num_channels, hidden)
    mu_w, mu_b = linear(ks[2], ks[3], hidden, z_dim)
    sig_w, sig_b = linear(ks[4], ks[5], hidden, z_dim)
    dec_w1, dec_b1 = linear(ks[6], ks[7], z_dim, hidden)
    dec_w2, dec_b2 = linear(ks[8], ks[9], hidden, num_channels)

    return dict(enc_w1=enc_w1, enc_b1=enc_b1,
                mu_w=mu_w, mu_b=mu_b,
                sig_w=sig_w, sig_b=sig_b,
                dec_w1=dec_w1, dec_b1=dec_b1,
                dec_w2=dec_w2, dec_b2=dec_b2)


def _reference_forward(x, eps, params):
    """Pure-JAX reference with the same bf16-MXU / f32-accumulate precision."""
    bf16, f32 = jnp.bfloat16, jnp.float32
    dot = lambda a, w: jnp.dot(a.astype(bf16), w.astype(bf16),
                               preferred_element_type=f32)
    h = jnp.maximum(dot(x, params["enc_w1"]) + params["enc_b1"], 0.0)
    mu = dot(h, params["mu_w"]) + params["mu_b"]
    log_sigma = dot(h, params["sig_w"]) + params["sig_b"]
    z = mu + jnp.exp(log_sigma / 2.0) * eps
    hd = jnp.maximum(dot(z, params["dec_w1"]) + params["dec_b1"], 0.0)
    logits = dot(hd, params["dec_w2"]) + params["dec_b2"]
    return jax.nn.sigmoid(logits)


if __name__ == "__main__":
    key = jax.random.PRNGKey(0)
    k_x, k_eps, k_p, k_x2, k_e2 = jax.random.split(key, 5)

    num_channels, hidden, z_dim = 32, 32, 16
    params = init_params(k_p, z_dim, hidden, num_channels)

    # Case 1: batch not tile-divisible (exercises minimal batch padding and the
    # bf16 streamed-copy path) with a small tile so the grid has several steps.
    b1 = 40
    x1 = jax.random.normal(k_x, (b1, num_channels), jnp.float32)
    e1 = jax.random.normal(k_eps, (b1, z_dim), jnp.float32)   # torch.randn equiv
    y1 = jax.block_until_ready(linear_vae_forward(x1, e1, params, batch_tile=16))

    # Case 2: default (large) tile, batch splits cleanly -> no wrapper copies,
    # f32 arrays streamed directly, 2 grid steps for v7x's two TensorCores.
    b2 = 64
    x2 = jax.random.normal(k_x2, (b2, num_channels), jnp.float32)
    e2 = jax.random.normal(k_e2, (b2, z_dim), jnp.float32)
    y2 = jax.block_until_ready(linear_vae_forward(x2, e2, params))

    for y, x_, e_, b_ in ((y1, x1, e1, b1), (y2, x2, e2, b2)):
        ref = _reference_forward(x_, e_, params)
        assert y.shape == (b_, num_channels)
        assert bool(jnp.all(jnp.isfinite(y)))
        assert jnp.allclose(y, ref, atol=1e-2, rtol=1e-2), \
            float(jnp.max(jnp.abs(y - ref)))
    print("KERNEL_OK")
</pallas_src>

<mosaic_0001>
module attributes {stable_mosaic.version = 11 : i64} {
  func.func @kernel(%arg0: i32, %arg1: memref<16x32xbf16, #tpu.memory_space<vmem>>, %arg2: memref<16x16xbf16, #tpu.memory_space<vmem>>, %arg3: memref<32x128xbf16, #tpu.memory_space<vmem>>, %arg4: memref<128x256xbf16, #tpu.memory_space<vmem>>, %arg5: memref<16x128xbf16, #tpu.memory_space<vmem>>, %arg6: memref<128x128xbf16, #tpu.memory_space<vmem>>, %arg7: memref<1x640xf32, #tpu.memory_space<vmem>>, %arg8: memref<16x128xf32, #tpu.memory_space<vmem>>) attributes {dimension_semantics = [#tpu.dimension_semantics<parallel>], iteration_bounds = array<i64: 3>, scalar_prefetch = 0 : i64, scratch_operands = 0 : i64, tpu.core_type = #tpu.core_type<tc>, window_params = [{transform_indices = @transform_0, window_bounds = array<i64: 16, 32>}, {transform_indices = @transform_1, window_bounds = array<i64: 16, 16>}, {pipeline_mode = #tpu.pipeline_mode<synchronous>, transform_indices = @transform_2, window_bounds = array<i64: 32, 128>}, {pipeline_mode = #tpu.pipeline_mode<synchronous>, transform_indices = @transform_3, window_bounds = array<i64: 128, 256>}, {pipeline_mode = #tpu.pipeline_mode<synchronous>, transform_indices = @transform_4, window_bounds = array<i64: 16, 128>}, {pipeline_mode = #tpu.pipeline_mode<synchronous>, transform_indices = @transform_5, window_bounds = array<i64: 128, 128>}, {pipeline_mode = #tpu.pipeline_mode<synchronous>, transform_indices = @transform_6, window_bounds = array<i64: 1, 640>}, {transform_indices = @transform_7, window_bounds = array<i64: 16, 128>}]} {
    %c0 = arith.constant 0 : index
    %c0_0 = arith.constant 0 : index
    %0 = vector.load %arg7[%c0, %c0_0] : memref<1x640xf32, #tpu.memory_space<vmem>>, vector<1x128xf32>
    %c0_1 = arith.constant 0 : index
    %c128 = arith.constant 128 : index
    %1 = vector.load %arg7[%c0_1, %c128] : memref<1x640xf32, #tpu.memory_space<vmem>>, vector<1x16xf32>
    %c0_2 = arith.constant 0 : index
    %c256 = arith.constant 256 : index
    %2 = vector.load %arg7[%c0_2, %c256] : memref<1x640xf32, #tpu.memory_space<vmem>>, vector<1x16xf32>
    %c0_3 = arith.constant 0 : index
    %c384 = arith.constant 384 : index
    %3 = vector.load %arg7[%c0_3, %c384] : memref<1x640xf32, #tpu.memory_space<vmem>>, vector<1x128xf32>
    %c0_4 = arith.constant 0 : index
    %c512 = arith.constant 512 : index
    %4 = vector.load %arg7[%c0_4, %c512] : memref<1x640xf32, #tpu.memory_space<vmem>>, vector<1x128xf32>
    %c0_5 = arith.constant 0 : index
    %c0_6 = arith.constant 0 : index
    %5 = vector.load %arg1[%c0_5, %c0_6] : memref<16x32xbf16, #tpu.memory_space<vmem>>, vector<16x32xbf16>
    %c0_7 = arith.constant 0 : index
    %c0_8 = arith.constant 0 : index
    %6 = vector.load %arg3[%c0_7, %c0_8] : memref<32x128xbf16, #tpu.memory_space<vmem>>, vector<32x128xbf16>
    %cst = arith.constant dense<0.000000e+00> : vector<16x128xf32>
    %7 = tpu.matmul %5, %6, %cst {dimension_numbers = #tpu.dot_dimension_numbers<[1], [0], [0], [1], [0, 0, 1, 1], [], []>} : vector<16x32xbf16>, vector<32x128xbf16>, vector<16x128xf32> -> vector<16x128xf32>
    %8 = vector.broadcast %0 : vector<1x128xf32> to vector<16x128xf32>
    %9 = arith.addf %7, %8 : vector<16x128xf32>
    %cst_9 = arith.constant 0.000000e+00 : f32
    %10 = vector.broadcast %cst_9 : f32 to vector<16x128xf32>
    %11 = arith.maximumf %9, %10 : vector<16x128xf32>
    %12 = arith.truncf %11 : vector<16x128xf32> to vector<16x128xbf16>
    %c0_10 = arith.constant 0 : index
    %c0_11 = arith.constant 0 : index
    %13 = vector.load %arg4[%c0_10, %c0_11] : memref<128x256xbf16, #tpu.memory_space<vmem>>, vector<128x256xbf16>
    %cst_12 = arith.constant dense<0.000000e+00> : vector<16x256xf32>
    %14 = tpu.matmul %12, %13, %cst_12 {dimension_numbers = #tpu.dot_dimension_numbers<[1], [0], [0], [1], [0, 0, 1, 1], [], []>} : vector<16x128xbf16>, vector<128x256xbf16>, vector<16x256xf32> -> vector<16x256xf32>
    %15 = vector.extract_strided_slice %14 {offsets = [0, 0], sizes = [16, 16], strides = [1, 1]} : vector<16x256xf32> to vector<16x16xf32>
    %16 = vector.broadcast %1 : vector<1x16xf32> to vector<16x16xf32>
    %17 = arith.addf %15, %16 : vector<16x16xf32>
    %18 = vector.extract_strided_slice %14 {offsets = [0, 128], sizes = [16, 16], strides = [1, 1]} : vector<16x256xf32> to vector<16x16xf32>
    %19 = vector.broadcast %2 : vector<1x16xf32> to vector<16x16xf32>
    %20 = arith.addf %18, %19 : vector<16x16xf32>
    %cst_13 = arith.constant 5.000000e-01 : f32
    %21 = vector.broadcast %cst_13 : f32 to vector<16x16xf32>
    %22 = arith.mulf %20, %21 : vector<16x16xf32>
    %23 = math.exp %22 : vector<16x16xf32>
    %c0_14 = arith.constant 0 : index
    %c0_15 = arith.constant 0 : index
    %24 = vector.load %arg2[%c0_14, %c0_15] : memref<16x16xbf16, #tpu.memory_space<vmem>>, vector<16x16xbf16>
    %25 = arith.extf %24 : vector<16x16xbf16> to vector<16x16xf32>
    %26 = arith.mulf %23, %25 : vector<16x16xf32>
    %27 = arith.addf %17, %26 : vector<16x16xf32>
    %28 = arith.truncf %27 : vector<16x16xf32> to vector<16x16xbf16>
    %c0_16 = arith.constant 0 : index
    %c0_17 = arith.constant 0 : index
    %29 = vector.load %arg5[%c0_16, %c0_17] : memref<16x128xbf16, #tpu.memory_space<vmem>>, vector<16x128xbf16>
    %cst_18 = arith.constant dense<0.000000e+00> : vector<16x128xf32>
    %30 = tpu.matmul %28, %29, %cst_18 {dimension_numbers = #tpu.dot_dimension_numbers<[1], [0], [0], [1], [0, 0, 1, 1], [], []>} : vector<16x16xbf16>, vector<16x128xbf16>, vector<16x128xf32> -> vector<16x128xf32>
    %31 = vector.broadcast %3 : vector<1x128xf32> to vector<16x128xf32>
    %32 = arith.addf %30, %31 : vector<16x128xf32>
    %cst_19 = arith.constant 0.000000e+00 : f32
    %33 = vector.broadcast %cst_19 : f32 to vector<16x128xf32>
    %34 = arith.maximumf %32, %33 : vector<16x128xf32>
    %35 = arith.truncf %34 : vector<16x128xf32> to vector<16x128xbf16>
    %c0_20 = arith.constant 0 : index
    %c0_21 = arith.constant 0 : index
    %36 = vector.load %arg6[%c0_20, %c0_21] : memref<128x128xbf16, #tpu.memory_space<vmem>>, vector<128x128xbf16>
    %cst_22 = arith.constant dense<0.000000e+00> : vector<16x128xf32>
    %37 = tpu.matmul %35, %36, %cst_22 {dimension_numbers = #tpu.dot_dimension_numbers<[1], [0], [0], [1], [0, 0, 1, 1], [], []>} : vector<16x128xbf16>, vector<128x128xbf16>, vector<16x128xf32> -> vector<16x128xf32>
    %38 = vector.broadcast %4 : vector<1x128xf32> to vector<16x128xf32>
    %39 = arith.addf %37, %38 : vector<16x128xf32>
    %cst_23 = arith.constant 5.000000e-01 : f32
    %40 = vector.broadcast %cst_23 : f32 to vector<16x128xf32>
    %41 = arith.mulf %40, %39 : vector<16x128xf32>
    %42 = math.tanh %41 : vector<16x128xf32>
    %cst_24 = arith.constant 5.000000e-01 : f32
    %43 = vector.broadcast %cst_24 : f32 to vector<16x128xf32>
    %44 = arith.mulf %43, %42 : vector<16x128xf32>
    %cst_25 = arith.constant 5.000000e-01 : f32
    %45 = vector.broadcast %cst_25 : f32 to vector<16x128xf32>
    %46 = arith.addf %44, %45 : vector<16x128xf32>
    %c0_26 = arith.constant 0 : index
    %c0_27 = arith.constant 0 : index
    %47 = vector.load %arg8[%c0_26, %c0_27] : memref<16x128xf32, #tpu.memory_space<vmem>>, vector<16x128xf32>
    tpu.vector_store %arg8[%c0_26, %c0_27], %46 {strides = array<i32>} : memref<16x128xf32, #tpu.memory_space<vmem>>, vector<16x128xf32>,
    return
  }
  func.func @transform_0(%arg0: i32) -> (i32, i32) {
    %c0_i32 = arith.constant 0 : i32
    %c0_i32_0 = arith.constant 0 : i32
    return %arg0, %c0_i32 : i32, i32
  }
  func.func @transform_1(%arg0: i32) -> (i32, i32) {
    %c0_i32 = arith.constant 0 : i32
    %c0_i32_0 = arith.constant 0 : i32
    return %arg0, %c0_i32 : i32, i32
  }
  func.func @transform_2(%arg0: i32) -> (i32, i32) {
    %c0_i32 = arith.constant 0 : i32
    %c0_i32_0 = arith.constant 0 : i32
    %c0_i32_1 = arith.constant 0 : i32
    return %c0_i32, %c0_i32_0 : i32, i32
  }
  func.func @transform_3(%arg0: i32) -> (i32, i32) {
    %c0_i32 = arith.constant 0 : i32
    %c0_i32_0 = arith.constant 0 : i32
    %c0_i32_1 = arith.constant 0 : i32
    return %c0_i32, %c0_i32_0 : i32, i32
  }
  func.func @transform_4(%arg0: i32) -> (i32, i32) {
    %c0_i32 = arith.constant 0 : i32
    %c0_i32_0 = arith.constant 0 : i32
    %c0_i32_1 = arith.constant 0 : i32
    return %c0_i32, %c0_i32_0 : i32, i32
  }
  func.func @transform_5(%arg0: i32) -> (i32, i32) {
    %c0_i32 = arith.constant 0 : i32
    %c0_i32_0 = arith.constant 0 : i32
    %c0_i32_1 = arith.constant 0 : i32
    return %c0_i32, %c0_i32_0 : i32, i32
  }
  func.func @transform_6(%arg0: i32) -> (i32, i32) {
    %c0_i32 = arith.constant 0 : i32
    %c0_i32_0 = arith.constant 0 : i32
    %c0_i32_1 = arith.constant 0 : i32
    return %c0_i32, %c0_i32_0 : i32, i32
  }
  func.func @transform_7(%arg0: i32) -> (i32, i32) {
    %c0_i32 = arith.constant 0 : i32
    %c0_i32_0 = arith.constant 0 : i32
    return %arg0, %c0_i32 : i32, i32
  }
}

</mosaic_0001>

<bundles_post_ra>
// kernel: tpu_custom_call.1
= control target key start
LH: loop header
LB: loop body
LE: loop exit
PB: predicated region body
PF: predicated region fallthrough
CT: control target
= control target key end

     0   :  { %12 = vsyncpa [#allocation3], 0  ;;  %s1358_s0 = inlined_call_operand.vmem [shape: bf16[48,32], index: 0, kind: input, shape index: {}]   ;;  %s1359_s1 = inlined_call_operand.vmem [shape: bf16[48,16], index: 1, kind: input, shape index: {}]   ;;  %s1360_s2 = inlined_call_operand.hbm [shape: bf16[32,128], index: 2, kind: input, shape index: {}]   ;;  %s1361_s3 = inlined_call_operand.hbm [shape: bf16[128,256], index: 3, kind: input, shape index: {}]   ;;  %s1362_s4 = inlined_call_operand.vmem [shape: bf16[16,128], index: 4, kind: input, shape index: {}]   ;;  %s1363_s5 = inlined_call_operand.vmem [shape: bf16[128,128], index: 5, kind: input, shape index: {}]   ;;  %s1364_s6 = inlined_call_operand.vmem [shape: f32[1,640], index: 6, kind: input, shape index: {}]   ;;  %s1365_s7 = inlined_call_operand.hbm [shape: f32[48,128], index: 7, kind: output, shape index: {}]  }
   0x1   :  { %13 = vsyncpa [#allocation6], 0 }
   0x2   :  { %14 = vsyncpa [#allocation4], 0 }
   0x3   :  { %16 = vsyncpa [#allocation4 + $0x1], 0  ;;  %s1197_s24 = smov 0   ;;  %s1199_s25 = smov 0  }
   0x4   :  { %s1201_s26 = smov 0   ;;  %s1203_s27 = smov 0  }
   0x5 LB: > { %s1218_s28 = sadd.s32 4294967295, %s1147_s27   ;;  %s773_s29 = sadd.s32 4294967294, %s1147_s27   ;;  %s1147_s27 = sphi %s1203_s27, %s1372_s27   ;;  %s1143_s26 = sphi %s1201_s26, %s1371_s26   ;;  %s1139_s25 = sphi %s1199_s25, %s1370_s25   ;;  %s1135_s24 = sphi %s1197_s24, %s1369_s24  }
   0x6   : > { %s1222_s30 = sadd.s32 1, %s1147_s27   ;;  %s186_s8 = sadd.s32 1, %s1143_s26 }
   0x7   : > { %s183_s9 = ssub.s32 %s1147_s27, %s1222_s30  ;;  %p196_p0 = scmp.ne.s32.totalorder %s1143_s26, %s1139_s25 }
   0x8   : > { %p184_p1 = scmp.eq.s32.totalorder %s183_s9, 0  ;;  %p197_p2 = scmp.eq.s32.totalorder %s1218_s28, 2 }
   0x9   : > { %p202_p3 = scmp.ne.s32.totalorder %s1139_s25, %s1135_s24  ;;  %p203_p4 = scmp.eq.s32.totalorder %s773_s29, 2 }
   0xa   : > { %s1233_s10 = scalar_select %p184_p1, %s1143_s26, %s186_s8  }
   0xb   : > { %p1235_p5 = por %p197_p2, %p196_p0  ;;  %p1239_p6 = por %p203_p4, %p202_p3 }
   0xc   : > { %p774_p7 = scmp.ge.s32.totalorder %s1147_s27, 1  ;;  %p210_p8 = scmp.lt.s32.totalorder %s1147_s27, 4 }
   0xd   : > { %p959_p9 = scmp.eq.s32.totalorder %s1218_s28, 0  ;;  %s221_s16 = sshll.u32 %s1360_s2, 4  ;;  %s222_s16 = int_to_ptr.hbm [resolvable:$true] %s221_s16 }
   0xe   : > { %p1246_p10 = pnand %p774_p7, %p210_p8  ;;  %s1149_s17 = smov [#allocation2]  }
   0xf   : > { %s223_s18 = sshll.u32 %s1149_s17, 4  ;;  %s235_s21 = sshll.u32 %s1361_s3, 4  ;;  %s224_s18 = int_to_ptr.vmem [resolvable:$true] %s223_s18  ;;  %s236_s21 = int_to_ptr.hbm [resolvable:$true] %s235_s21 }
  0x10   : > { %p948_p11 = pneg %p1246_p10  ;;  %s1150_s22 = smov 64  }
  0x11   : > { %s1151_s23 = smov 4   ;;  %s1152_s29 = smov [#allocation5]  }
  0x12   : > { %p949_p12 = pnand %p959_p9, %p948_p11  ;;  %s237_s8 = sshll.u32 %s1152_s29, 4  ;;  %s238_s8 = int_to_ptr.vmem [resolvable:$true] %s237_s8 }
  0x13   : > { %s1153_s9 = smov 128   ;;  %s1154_s14 = smov 8  }
  0x14   : > { %951 = dma.hbm_to_vmem [thread:$0]  (!%p949_p12), %s222_s16, 256, %s224_s18, [#allocation3], %s1150_s22, %s1150_s22, %s1151_s23  }
  0x15   : > { %954 = dma.hbm_to_vmem [thread:$0]  (!%p949_p12), %s236_s21, 2048, %s238_s8, [#allocation6], %s1153_s9, %s1153_s9, %s1154_s14  }
  0x16   : > { %280 = sbr.rel (%p1246_p10) target bundleno = 636 (0x27c), region = 48 }
  0x1b   : > { %1122 = dma.done.wait (%p959_p9), [#allocation3], 256  }
  0x1c   : > { %1124 = vsyncadd (%p959_p9), [#allocation3], 4294967040 }
  0x1d   : > { %1126 = dma.done.wait (%p959_p9), [#allocation6], 2048  }
  0x1e   : > { %1128 = vsyncadd (%p959_p9), [#allocation6], 4294965248  ;;  %s782_s15 = sshll.u32 %s1218_s28, 1  ;;  %v907_v0 = vld [vmem:[#allocation2 + $0x8] sm:$0xff]  ;;  %v906_v1 = vld [vmem:[#allocation2] sm:$0xff]  ;;  %vm368_vm0 = vcmask 261120  }
  0x1f   : > { %p324_p13 = scmp.lt.s32.totalorder %s782_s15, 5  ;;  %v857_v2 = vld [vmem:[#allocation5 + $0x70] sm:$0xf]  ;;  %v923_v3 = vld [vmem:[#allocation5 + $0x74] sm:$0xf0]  ;;  %378 = vmatpush.bf16.msra.mxu0 %v907_v0  ;;  %v932_v60 = vld [vmem:[%s1363_s5 + $0x38] sm:$0xff] }
  0x20   : > { %v858_v4 = vor.u32 %v923_v3, %v857_v2  ;;  %v922_v5 = vld [vmem:[#allocation5 + $0x74] sm:$0xf]  ;;  %v859_v6 = vld [vmem:[#allocation5 + $0x78] sm:$0xf0]  ;;  %v849_v7 = vld [vmem:[#allocation5 + $0x60] sm:$0xf]  ;;  %637 = vmatpush.bf16.msra.mxu3 %v932_v60 }
  0x21   : > { %s1374_s15 = smov (!%p324_p13, %s782_s15), 5  ;;  %v862_v8 = vor.u32 %v922_v5, %v859_v6  ;;  %v921_v9 = vld [vmem:[#allocation5 + $0x64] sm:$0xf0]  ;;  %v920_v10 = vld [vmem:[#allocation5 + $0x64] sm:$0xf]  ;;  %v924_v59 = vld [vmem:[%s1362_s4] sm:$0xff] }
  0x22   : > { %s783_s13 = sshll.u32 %s1374_s15, 2  ;;  %v851_v11 = vld [vmem:[#allocation5 + $0x68] sm:$0xf0]  ;;  %485 = vmatpush.bf16.msra.mxu1 %v858_v4  ;;  %v850_v12 = vor.u32 %v921_v9, %v849_v7  ;;  %v841_v15 = vld [vmem:[#allocation5 + $0x50] sm:$0xf]  ;;  %v931_v62 = vld [vmem:[%s1363_s5 + $0x30] sm:$0xff] }
  0x23   : > { %s327_s18 = scalar_lea.vmem %s1358_s0, %s783_s13  ;;  %499 = vmatpush.bf16.msra.mxu2 %v862_v8  ;;  %v854_v14 = vor.u32 %v920_v10, %v851_v11  ;;  %v919_v16 = vld [vmem:[#allocation5 + $0x54] sm:$0xf0]  ;;  %379 = vmatpush.bf16.msra.mxu0 %v906_v1  ;;  %v918_v17 = vld [vmem:[#allocation5 + $0x54] sm:$0xf]  ;;  %v843_v18 = vld [vmem:[#allocation5 + $0x58] sm:$0xf0]  ;;  %s333_s23 = scalar_lea.vmem %s1359_s1, %s783_s13 }
  0x24   : > { %v905_v13 = vld [vmem:[%s327_s18] sm:$0xff]  ;;  %v842_v19 = vor.u32 %v919_v16, %v841_v15  ;;  %v846_v20 = vor.u32 %v918_v17, %v843_v18  ;;  %v833_v21 = vld [vmem:[#allocation5 + $0x40] sm:$0xf]  ;;  %v917_v22 = vld [vmem:[#allocation5 + $0x44] sm:$0xf0]  ;;  %638 = vmatpush.bf16.msra.mxu3 %v931_v62  ;;  %vm549_vm1 = vcmask 130048  }
  0x25   : > { %v916_v23 = vld [vmem:[#allocation5 + $0x44] sm:$0xf]  ;;  %v835_v24 = vld [vmem:[#allocation5 + $0x48] sm:$0xf0]  ;;  %v834_v25 = vor.u32 %v917_v22, %v833_v21  ;;  %v825_v27 = vld [vmem:[#allocation5 + $0x30] sm:$0xf] }
  0x26   : > { %486 = vmatpush.bf16.msra.mxu1 %v850_v12  ;;  %798 = vmatmul.msk.bf16.vlgmr.msra.gmra.mxu0 %vm368_vm0, %v905_v13  ;;  %v838_v26 = vor.u32 %v916_v23, %v835_v24  ;;  %v915_v28 = vld [vmem:[#allocation5 + $0x34] sm:$0xf0]  ;;  %v914_v29 = vld [vmem:[#allocation5 + $0x34] sm:$0xf]  ;;  %v827_v31 = vld [vmem:[#allocation5 + $0x38] sm:$0xf0] }
  0x27   : > { %500 = vmatpush.bf16.msra.mxu2 %v854_v14  ;;  %v826_v30 = vor.u32 %v915_v28, %v825_v27  ;;  %v830_v32 = vor.u32 %v914_v29, %v827_v31  ;;  %v817_v33 = vld [vmem:[#allocation5 + $0x20] sm:$0xf]  ;;  %v913_v34 = vld [vmem:[#allocation5 + $0x24] sm:$0xf0]  ;;  %v912_v35 = vld [vmem:[#allocation5 + $0x24] sm:$0xf]  ;;  %560 = vmatpush.bf16.msrb.mxu0 %v924_v59 }
  0x28   : > { %v818_v36 = vor.u32 %v913_v34, %v817_v33  ;;  %v819_v37 = vld [vmem:[#allocation5 + $0x28] sm:$0xf0]  ;;  %v809_v39 = vld [vmem:[#allocation5 + $0x10] sm:$0xf]  ;;  %v911_v40 = vld [vmem:[#allocation5 + $0x14] sm:$0xf0] }
  0x29   : > { %v822_v38 = vor.u32 %v912_v35, %v819_v37  ;;  %v910_v41 = vld [vmem:[#allocation5 + $0x14] sm:$0xf]  ;;  %v810_v42 = vor.u32 %v911_v40, %v809_v39  ;;  %v811_v43 = vld [vmem:[#allocation5 + $0x18] sm:$0xf0]  ;;  %v801_v45 = vld [vmem:[#allocation5] sm:$0xf] }
  0x2a   : > { %487 = vmatpush.bf16.msra.mxu1 %v842_v19  ;;  %v814_v44 = vor.u32 %v910_v41, %v811_v43  ;;  %v909_v46 = vld [vmem:[#allocation5 + $0x4] sm:$0xf0]  ;;  %v908_v47 = vld [vmem:[#allocation5 + $0x4] sm:$0xf]  ;;  %v803_v49 = vld [vmem:[#allocation5 + $0x8] sm:$0xf0] }
  0x2b   : > { %501 = vmatpush.bf16.msra.mxu2 %v846_v20  ;;  %v802_v48 = vor.u32 %v909_v46, %v801_v45  ;;  %v806_v50 = vor.u32 %v908_v47, %v803_v49  ;;  %v1004_v52 = vld [vmem:[%s1364_s6] ss:$0 sm:$0xff]  ;;  %v1006_v61 = vld [vmem:[%s1364_s6 + $0x2] ss:$0 sm:$0xff]  ;;  %v930_v1 = vld [vmem:[%s1363_s5 + $0x28] sm:$0xff]  ;;  %s320_s29 = sand.u32 1, %s1139_s25  }
  0x2c   : > { %639 = vmatpush.bf16.msra.mxu3 %v930_v1  ;;  %v929_v3 = vld [vmem:[%s1363_s5 + $0x20] sm:$0xff]  ;;  %v928_v24 = vld [vmem:[%s1363_s5 + $0x18] sm:$0xff]  ;;  %s781_s8 = sshll.u32 %s320_s29, 4  ;;  %s933_s15 = sshll.u32 %s1218_s28, 4 }
  0x2d   : > { %v935_v9 = vld [vmem:[%s333_s23] sm:$0xff]   ;;  %s673_s14 = scalar_lea.hbm %s1365_s7, %s933_s15  ;;  %s322_s16 = scalar_lea.vmem [#allocation7], %s781_s8 }
  0x2e   : > { %488 = vmatpush.bf16.msra.mxu1 %v834_v25  ;;  %v936_v11 = vunpack.c.l.bf16 %v935_v9  ;;  %v937_v13 = vunpack.c.h.bf16 %v935_v9  ;;  %v1005_v14 = vld [vmem:[%s1364_s6 + $0x1] ss:$0 sm:$0xff]  ;;  %v927_v25 = vld [vmem:[%s1363_s5 + $0x10] sm:$0xff]  ;;  %v1007_v29 = vld [vmem:[%s1364_s6 + $0x3] ss:$0 sm:$0xff]  ;;  %s674_s17 = sshll.u32 %s322_s16, 4  ;;  %s675_s17 = int_to_ptr.vmem [resolvable:$true] %s674_s17 }
  0x2f   : > { %502 = vmatpush.bf16.msra.mxu2 %v838_v26  ;;  %v926_v26 = vld [vmem:[%s1363_s5 + $0x8] sm:$0xff]  ;;  %v925_v27 = vld [vmem:[%s1363_s5] sm:$0xff]  ;;  %s676_s18 = sshll.u32 %s673_s14, 4  ;;  %s662_s19 = scalar_lea.sflag [#allocation4], %s320_s29  ;;  %s677_s18 = int_to_ptr.hbm [resolvable:$true] %s676_s18 }
  0x30   : > { %640 = vmatpush.bf16.msra.mxu3 %v929_v3  ;;  %s1091_s20 = sshra.s32 %s677_s18, 4  ;;  %s1097_s23 = scalar_lea.hbm %s1365_s7, 48  ;;  %s1092_s20 = int_to_ptr.hbm [resolvable:$true] %s1091_s20 }
  0x31   : > { %s1093_s28 = scalar_lea.hbm %s1092_s20, 16  ;;  %p1098_p3 = scmp.lt.s32.totalorder %s1092_s20, %s1365_s7 }
  0x32   : > { %489 = vmatpush.bf16.msra.mxu1 %v826_v30  ;;  %p1094_p0 = scmp.ne.s32.totalorder %s1092_s20, %s1093_s28  ;;  %p1099_p4 = scmp.lt.s32.totalorder %s1097_s23, %s1093_s28 }
  0x33   : > { %503 = vmatpush.bf16.msra.mxu2 %v830_v32 }
  0x34   : > { %641 = vmatpush.bf16.msra.mxu3 %v928_v24  ;;  %p1095_p1 = pnand %p1094_p0, %p1235_p5  ;;  %p1100_p7 = por %p1099_p4, %p1098_p3 }
  0x36   : > { %490 = vmatpush.bf16.msra.mxu1 %v818_v36  ;;  %v1008_v36 = vld [vmem:[%s1364_s6 + $0x4] ss:$0 sm:$0xff]  ;;  %p1096_p2 = pneg %p1095_p1 }
  0x37   : > { %504 = vmatpush.bf16.msra.mxu2 %v822_v38 }
  0x38   : > { %642 = vmatpush.bf16.msra.mxu3 %v927_v25  ;;  %p1101_p8 = pnand %p1100_p7, %p1096_p2 }
  0x3a   : > { %491 = vmatpush.bf16.msra.mxu1 %v810_v42 }
  0x3b   : > { %505 = vmatpush.bf16.msra.mxu2 %v814_v44 }
  0x3c   : > { %643 = vmatpush.bf16.msra.mxu3 %v926_v26 }
  0x3e   : > { %492 = vmatpush.bf16.msra.mxu1 %v802_v48 }
  0x3f   : > { %506 = vmatpush.bf16.msra.mxu2 %v806_v50 }
  0x40   : > { %644 = vmatpush.bf16.msra.mxu3 %v925_v27 }
  0xa3   : > { %v381_v51 = vpop.f32.mrf.mxu0 }
  0xa4   : > { %v382_v53 = vadd.f32 %v1004_v52, %v381_v51 }
  0xa6   : > { %v386_v56 = vmax.f32 %v382_v53, 0.0 }
  0xab   : > { %v383_v54 = vpop.f32.mrf.mxu0 }
  0xac   : > { %v384_v55 = vadd.f32 %v1004_v52, %v383_v54 }
  0xae   : > { %v387_v57 = vmax.f32 %v384_v55, 0.0 }
  0xb0   : > { %v388_v58 = vpack.c.bf16 %v387_v57, %v386_v56 }
  0xb2   : > { %493 = vmatmul.bf16.vlgmr.msra.gmra.mxu1 %v388_v58  ;;  %507 = vmatmul.bf16.vlgmr.msra.gmra.mxu2 %v388_v58 }
 0x12f   : > { %v494_v6 = vpop.f32.mrf.mxu1 }
 0x130   : > { %v516_v18 = vadd.f32 %v1005_v14, %v494_v6 }
 0x135   : > { %v508_v63 = vpop.f32.mrf.mxu2 }
 0x136   : > { %v521_v0 = vadd.f32 %v1006_v61, %v508_v63 }
 0x137   : > { %v496_v15 = vpop.f32.mrf.mxu1 }
 0x138   : > { %v523_v2 = vmul.f32 0.5, %v521_v0  ;;  %v517_v19 = vadd.f32 %v1005_v14, %v496_v15 }
 0x13a   : > { %v525_v4 = vmul.f32 1.442695, %v523_v2 }
 0x13c   : > { %1009 = vpow2.f32 %v525_v4 }
 0x13d   : > { %v510_v5 = vpop.f32.mrf.mxu2 }
 0x13e   : > { %v522_v7 = vadd.f32 %v1006_v61, %v510_v5 }
 0x140   : > { %v524_v8 = vmul.f32 0.5, %v522_v7 }
 0x142   : > { %v527_v10 = vmul.f32 1.442695, %v524_v8  ;;  %v1010_v12 = vpop.eup %1009 }
 0x143   : > { %v533_v16 = vmul.f32 %v1010_v12, %v936_v11 }
 0x144   : > { %1011 = vpow2.f32 %v527_v10 }
 0x145   : > { %v535_v21 = vadd.f32 %v533_v16, %v516_v18 }
 0x14a   : > { %v1012_v17 = vpop.eup %1011 }
 0x14b   : > { %v534_v20 = vmul.f32 %v1012_v17, %v937_v13 }
 0x14d   : > { %v536_v22 = vadd.f32 %v534_v20, %v517_v19 }
 0x14f   : > { %v537_v23 = vpack.c.bf16 %v536_v22, %v535_v21 }
 0x151   : > { %867 = vmatmul.msk.bf16.vlgmr.msrb.gmra.mxu0 %vm549_vm1, %v537_v23 }
 0x1ce   : > { %v562_v28 = vpop.f32.mrf.mxu0 }
 0x1cf   : > { %v563_v30 = vadd.f32 %v1007_v29, %v562_v28 }
 0x1d1   : > { %v567_v33 = vmax.f32 %v563_v30, 0.0 }
 0x1d6   : > { %v564_v31 = vpop.f32.mrf.mxu0 }
 0x1d7   : > { %v565_v32 = vadd.f32 %v1007_v29, %v564_v31 }
 0x1d9   : > { %v568_v34 = vmax.f32 %v565_v32, 0.0 }
 0x1db   : > { %v569_v35 = vpack.c.bf16 %v568_v34, %v567_v33 }
 0x1dd   : > { %645 = vmatmul.bf16.vlgmr.msra.gmra.mxu3 %v569_v35 }
 0x260   : > { %v646_v37 = vpop.f32.mrf.mxu3 }
 0x261   : > { %v647_v38 = vadd.f32 %v1008_v36, %v646_v37 }
 0x263   : > { %v651_v39 = vmul.f32 0.5, %v647_v38 }
 0x265   : > { %1013 = vtanh.f32 %v651_v39 }
 0x268   : > { %v648_v40 = vpop.f32.mrf.mxu3 }
 0x269   : > { %v649_v41 = vadd.f32 %v1008_v36, %v648_v40 }
 0x26b   : > { %v1014_v42 = vpop.eup %1013  ;;  %v652_v43 = vmul.f32 0.5, %v649_v41 }
 0x26c   : > { %v655_v44 = vmul.f32 0.5, %v1014_v42 }
 0x26d   : > { %1015 = vtanh.f32 %v652_v43 }
 0x26e   : > { %v657_v45 = vadd.f32 0.5, %v655_v44 }
 0x270   : > { %659 = vst [vmem:[%s322_s16] sm:$0xff] %v657_v45 }
 0x273   : > { %v1016_v46 = vpop.eup %1015 }
 0x274   : > { %v656_v47 = vmul.f32 0.5, %v1016_v46 }
 0x276   : > { %v658_v48 = vadd.f32 0.5, %v656_v47 }
 0x278   : > { %660 = vst [vmem:[%s322_s16 + $0x8] sm:$0xff] %v658_v48 }
 0x279   : > { %1104 = shalt.err (!%p1101_p8)
}
 0x27a   : > { %s1155_s29 = smov 128   ;;  %s1156_s13 = smov 8  }
 0x27b   : > { %946 = dma.vmem_to_hbm [thread:$0]  (%p1235_p5), %s675_s17, 256, %s677_s18, %s662_s19, %s1155_s29, %s1155_s29, %s1156_s13  }
 0x27c PF: > { %p963_p9 = scmp.ge.s32.totalorder %s1147_s27, 2  ;;  %s691_s9 = sand.u32 1, %s1135_s24  }
 0x27d   : > { %s692_s14 = scalar_lea.sflag [#allocation4], %s691_s9 }
 0x27e   : > { %p956_p10 = pnand %p963_p9, %p1239_p6 }
 0x280   : > { %p957_p11 = pneg %p956_p10 }
 0x282   : > { %1130 = dma.done.wait (%p957_p11), %s692_s14, 256  }
 0x283   : > { %1132 = vsyncadd (%p957_p11), %s692_s14, 4294967040  ;;  %p19_p12 = scmp.ge.s32.totalorder %s1222_s30, 5   ;;  %s1369_s24 = smov %s1139_s25 }
 0x284   : > { %s1370_s25 = smov %s1143_s26  ;;  %s1371_s26 = smov %s1233_s10 }
 0x285   : > { %s1372_s27 = smov %s1222_s30  ;;  %21 = sbr.rel (!%p19_p12) target bundleno = 5 (0x5), region = 95 }
 0x28a   :  { %698 = vsyncpa [#allocation3], 1 }
 0x28b   :  { %700 = vsyncpa [#allocation3 + $0x1], 1 }
 0x28c   :  { %701 = vsyncpa [#allocation6], 1 }
 0x28d   :  { %702 = vsyncpa [#allocation4], 1 }
 0x28e   :  { %704 = vsyncpa [#allocation4 + $0x1], 1 }

</bundles_post_ra>
